<compile_context>
chip_gen: v7x
topology: tpu7x:2x2x1
jax: 0.10.0
libtpu: 0.0.40
codegen_flags: <defaults>
</compile_context>

<pallas_src>
import jax
import jax.numpy as jnp
from jax.experimental import pallas as pl
from jax.experimental.pallas import tpu as pltpu


def temporal_att_decoder_kernel(
    nday_ref,    # (BB, 1)       i32  VMEM
    g_ref,       # (BB, T, G)    f32  VMEM
    gT_ref,      # (BB, 1, Gp)   f32  VMEM  (lane-padded g_T)
    wfused_ref,  # (G, 2*Gp)     f32  VMEM  [w1 | 0 | wp | 0]
    w2_ref,      # (1, Gp)       f32  VMEM  (lane-padded vi-reduce second weight)
    wta_ref,     # (G, Y)        f32  VMEM
    wtb_ref,     # (Gp, Y)       f32  VMEM  (row-padded)
    bt_ref,      # (1, Y)        f32  VMEM
    b2_ref,      # (1, 1)        f32  VMEM
    out_ref,     # (BB, Y + T)   f32  VMEM  [y_T | v_stared] slab
):
    BB, T, G = g_ref.shape
    Gp = gT_ref.shape[-1]

    g3 = g_ref[...]                          # (BB, T, G)
    g2 = g3.reshape(BB * T, G)               # flatten leading dims (layout no-op)
    gT = gT_ref[...]                         # (BB, 1, Gp)

    # ---- fused G -> 2*Gp projection: one MXU pass + one tanh for both branches ----
    h = jnp.tanh(jnp.dot(g2, wfused_ref[...], preferred_element_type=jnp.float32))
    h1 = h[:, :Gp].reshape(BB, T, Gp)        # vi branch    (tile-aligned view)
    projd = h[:, Gp:].reshape(BB, T, Gp)     # projd branch (tile-aligned view)

    # vi = Linear(G,1)(tanh(Linear(G,G)(g)))  -> (BB, T)   (padded lanes are zeros)
    vi = jnp.sum(h1 * w2_ref[...].reshape(1, 1, Gp), axis=-1) + b2_ref[...]
    # vd = <projd, g_T>                       -> (BB, T)
    vd = jnp.sum(projd * gT, axis=-1)
    aux = vi * vd

    # TODO(synk): generate_mask is not defined in the provided source; a standard
    #             per-row length mask (valid iff t < n_day[b]) is assumed.
    t_ids = jax.lax.broadcasted_iota(jnp.int32, (BB, T), 1)
    aux = jnp.where(t_ids < nday_ref[...], aux, -1.0e9)

    # v_stared = softmax(aux, -1)
    m = jnp.max(aux, axis=-1, keepdims=True)
    e = jnp.exp(aux - m)
    v = e / jnp.sum(e, axis=-1, keepdims=True)           # (BB, T)

    # att_c[b] = v[b] @ g[b]   (T tiny -> VPU broadcast-mul + sublane reduce)
    att_c = jnp.sum(v[:, :, None] * g3, axis=1)          # (BB, G)

    # y_T = softmax(Linear(2G, Y)(cat([att_c, g_T], -1)), -1)
    # computed as two dots (no in-vreg lane concat); wt_b is row-padded to Gp.
    logits = (
        jnp.dot(att_c, wta_ref[...], preferred_element_type=jnp.float32)
        + jnp.dot(gT.reshape(BB, Gp), wtb_ref[...], preferred_element_type=jnp.float32)
        + bt_ref[...]
    )                                                     # (BB, Y)
    lm = jnp.max(logits, axis=-1, keepdims=True)
    le = jnp.exp(logits - lm)
    y = le / jnp.sum(le, axis=-1, keepdims=True)          # (BB, Y)

    # One lane-dense store for both outputs.
    out_ref[...] = jnp.concatenate([y, v], axis=-1)       # (BB, Y+T)


def _round_up(x, m):
    return ((x + m - 1) // m) * m


def prepare_params(params, G, Y, Gp):
    """Pad / fuse weights into MXU- and lane-friendly layouts (done once, in XLA)."""
    w_fused = jnp.zeros((G, 2 * Gp), jnp.float32)
    w_fused = w_fused.at[:, :G].set(params["w1"].astype(jnp.float32))
    w_fused = w_fused.at[:, Gp:Gp + G].set(params["wp"].astype(jnp.float32))
    w2_pad = jnp.zeros((1, Gp), jnp.float32).at[:, :G].set(params["w2"].astype(jnp.float32))
    wtb_pad = jnp.zeros((Gp, Y), jnp.float32).at[:G, :].set(params["wt_b"].astype(jnp.float32))
    wta = params["wt_a"].astype(jnp.float32)
    bt = params["bt"].reshape(1, Y).astype(jnp.float32)
    b2 = params["b2"].reshape(1, 1).astype(jnp.float32)
    return w_fused, w2_pad, wta, wtb_pad, bt, b2


def temporal_att_decoder(g, y, g_T, n_day, params, *, block_b=None):
    """Wrapper calling the Pallas kernel. `y` is unused (matches the torch forward)."""
    del y
    B, T, G = g.shape
    Y = params["wt_a"].shape[1]
    LANE = 128
    Gp = _round_up(G, LANE)

    # Batch block: aim for ~256 MXU rows (BB*T) per grid step, 8-sublane aligned,
    # capped near B so small batches still give a short grid.  The double-buffered
    # (BB, T, G) f32 input stays far below the scoped-VMEM limits on all
    # generations (v5e 16 MiB default, v6e/v7x 32 MiB).
    if block_b is None:
        block_b = max(8, (max(1, 256 // max(T, 1)) // 8) * 8)
        block_b = min(block_b, _round_up(B, 8))
    assert block_b % 8 == 0, "block_b must be a multiple of 8 (sublane alignment)"

    nb = pl.cdiv(B, block_b)
    B_pad = nb * block_b

    # Pad the batch (padded rows get n_day = 0 and are sliced off below) and pad the
    # g_T lane dim to Gp so the projd branch needs no sub-tile slice in the kernel.
    g_p = jnp.pad(g.astype(jnp.float32), ((0, B_pad - B), (0, 0), (0, 0)))
    gT_p = jnp.pad(g_T.astype(jnp.float32), ((0, B_pad - B), (0, 0), (0, Gp - G)))
    nday_p = jnp.pad(jnp.asarray(n_day).reshape(B, 1).astype(jnp.int32),
                     ((0, B_pad - B), (0, 0)))

    w_fused, w2_pad, wta, wtb_pad, bt, b2 = prepare_params(params, G, Y, Gp)

    out = pl.pallas_call(
        temporal_att_decoder_kernel,
        out_shape=jax.ShapeDtypeStruct((B_pad, Y + T), jnp.float32),
        grid=(nb,),
        in_specs=[
            pl.BlockSpec((block_b, 1), lambda i: (i, 0)),         # n_day
            pl.BlockSpec((block_b, T, G), lambda i: (i, 0, 0)),   # g
            pl.BlockSpec((block_b, 1, Gp), lambda i: (i, 0, 0)),  # g_T (padded)
            pl.BlockSpec((G, 2 * Gp), lambda i: (0, 0)),          # fused [w1 | wp]
            pl.BlockSpec((1, Gp), lambda i: (0, 0)),              # w2 (padded)
            pl.BlockSpec((G, Y), lambda i: (0, 0)),               # wt_a
            pl.BlockSpec((Gp, Y), lambda i: (0, 0)),              # wt_b (padded)
            pl.BlockSpec((1, Y), lambda i: (0, 0)),               # bt
            pl.BlockSpec((1, 1), lambda i: (0, 0)),               # b2
        ],
        out_specs=pl.BlockSpec((block_b, Y + T), lambda i: (i, 0)),
        compiler_params=pltpu.CompilerParams(
            dimension_semantics=("parallel",),  # shard batch blocks over v7x's 2 TCs
        ),
    )(nday_p, g_p, gT_p, w_fused, w2_pad, wta, wtb_pad, bt, b2)

    y_T = out[:B, :Y]
    v_stared = out[:B, Y:]
    return y_T, v_stared


def reference(g, g_T, n_day, p):
    """Pure-JAX reference of the torch forward (for correctness check)."""
    B, T, G = g.shape
    h1 = jnp.tanh(jnp.einsum("btg,gh->bth", g, p["w1"]))
    vi = jnp.sum(h1 * p["w2"][None, :, :], axis=-1) + p["b2"][0, 0]
    projd = jnp.tanh(jnp.einsum("btg,gh->bth", g, p["wp"]))
    vd = jnp.sum(projd * g_T, axis=-1)
    aux = vi * vd
    t_ids = jnp.arange(T, dtype=jnp.int32)[None, :]
    aux = jnp.where(t_ids < n_day.reshape(B, 1), aux, -1.0e9)
    v = jax.nn.softmax(aux, axis=-1)
    att_c = jnp.einsum("bt,btg->bg", v, g)
    logits = att_c @ p["wt_a"] + g_T[:, 0, :] @ p["wt_b"] + p["bt"]
    return jax.nn.softmax(logits, axis=-1), v


if __name__ == "__main__":
    B, T, G, Y = 16, 8, 32, 8   # batch, n_days (seq), config.g_size, config.y_size

    key = jax.random.PRNGKey(0)
    ks = jax.random.split(key, 11)

    # Inputs
    g = jax.random.normal(ks[0], (B, T, G), dtype=jnp.float32)
    y_unused = jax.random.normal(ks[1], (B, T, Y), dtype=jnp.float32)
    g_T = jax.random.normal(ks[2], (B, 1, G), dtype=jnp.float32)
    n_day = jax.random.randint(ks[3], (B, 1), 1, T + 1, dtype=jnp.int32)

    # Parameters (torch nn.Linear(in,out) weight is (out,in), applied as x @ W.T,
    # so the transposed weights are stored directly).
    scale = 0.1
    params = {
        "w1":   scale * jax.random.normal(ks[4], (G, G), dtype=jnp.float32),
        "w2":   scale * jax.random.normal(ks[5], (1, G), dtype=jnp.float32),
        "b2":   scale * jax.random.normal(ks[6], (1, 1), dtype=jnp.float32),
        "wp":   scale * jax.random.normal(ks[7], (G, G), dtype=jnp.float32),
        "wt_a": scale * jax.random.normal(ks[8], (G, Y), dtype=jnp.float32),
        "wt_b": scale * jax.random.normal(ks[9], (G, Y), dtype=jnp.float32),
        "bt":   scale * jax.random.normal(ks[10], (1, Y), dtype=jnp.float32),
    }

    # block_b=8 -> grid=(2,): demonstrates batching and gives both v7x TCs work.
    y_T, v_stared = temporal_att_decoder(g, y_unused, g_T, n_day, params, block_b=8)
    y_T = jax.block_until_ready(y_T)
    v_stared = jax.block_until_ready(v_stared)

    y_ref, v_ref = reference(g, g_T, n_day, params)
    assert jnp.allclose(y_T, y_ref, atol=1e-5, rtol=1e-5), "y_T mismatch"
    assert jnp.allclose(v_stared, v_ref, atol=1e-5, rtol=1e-5), "v_stared mismatch"

    print("KERNEL_OK")
</pallas_src>

<mosaic_0001>
module attributes {stable_mosaic.version = 11 : i64} {
  func.func @temporal_att_decoder_kernel(%arg0: i32, %arg1: memref<8x1xi32, #tpu.memory_space<vmem>>, %arg2: memref<8x8x32xf32, #tpu.memory_space<vmem>>, %arg3: memref<8x1x128xf32, #tpu.memory_space<vmem>>, %arg4: memref<32x256xf32, #tpu.memory_space<vmem>>, %arg5: memref<1x128xf32, #tpu.memory_space<vmem>>, %arg6: memref<32x8xf32, #tpu.memory_space<vmem>>, %arg7: memref<128x8xf32, #tpu.memory_space<vmem>>, %arg8: memref<1x8xf32, #tpu.memory_space<vmem>>, %arg9: memref<1x1xf32, #tpu.memory_space<vmem>>, %arg10: memref<8x16xf32, #tpu.memory_space<vmem>>) attributes {dimension_semantics = [#tpu.dimension_semantics<parallel>], iteration_bounds = array<i64: 2>, scalar_prefetch = 0 : i64, scratch_operands = 0 : i64, tpu.core_type = #tpu.core_type<tc>, window_params = [{transform_indices = @transform_0, window_bounds = array<i64: 8, 1>}, {transform_indices = @transform_1, window_bounds = array<i64: 8, 8, 32>}, {transform_indices = @transform_2, window_bounds = array<i64: 8, 1, 128>}, {pipeline_mode = #tpu.pipeline_mode<synchronous>, transform_indices = @transform_3, window_bounds = array<i64: 32, 256>}, {pipeline_mode = #tpu.pipeline_mode<synchronous>, transform_indices = @transform_4, window_bounds = array<i64: 1, 128>}, {pipeline_mode = #tpu.pipeline_mode<synchronous>, transform_indices = @transform_5, window_bounds = array<i64: 32, 8>}, {pipeline_mode = #tpu.pipeline_mode<synchronous>, transform_indices = @transform_6, window_bounds = array<i64: 128, 8>}, {pipeline_mode = #tpu.pipeline_mode<synchronous>, transform_indices = @transform_7, window_bounds = array<i64: 1, 8>}, {pipeline_mode = #tpu.pipeline_mode<synchronous>, transform_indices = @transform_8, window_bounds = array<i64: 1, 1>}, {transform_indices = @transform_9, window_bounds = array<i64: 8, 16>}]} {
    %c0 = arith.constant 0 : index
    %c0_0 = arith.constant 0 : index
    %c0_1 = arith.constant 0 : index
    %0 = vector.load %arg2[%c0, %c0_0, %c0_1] : memref<8x8x32xf32, #tpu.memory_space<vmem>>, vector<8x8x32xf32>
    %1 = vector.shape_cast %0 : vector<8x8x32xf32> to vector<64x32xf32>
    %c0_2 = arith.constant 0 : index
    %c0_3 = arith.constant 0 : index
    %c0_4 = arith.constant 0 : index
    %2 = vector.load %arg3[%c0_2, %c0_3, %c0_4] : memref<8x1x128xf32, #tpu.memory_space<vmem>>, vector<8x1x128xf32>
    %c0_5 = arith.constant 0 : index
    %c0_6 = arith.constant 0 : index
    %3 = vector.load %arg4[%c0_5, %c0_6] : memref<32x256xf32, #tpu.memory_space<vmem>>, vector<32x256xf32>
    %cst = arith.constant dense<0.000000e+00> : vector<64x256xf32>
    %4 = tpu.matmul %1, %3, %cst {dimension_numbers = #tpu.dot_dimension_numbers<[1], [0], [0], [1], [0, 0, 1, 1], [], []>} : vector<64x32xf32>, vector<32x256xf32>, vector<64x256xf32> -> vector<64x256xf32>
    %5 = math.tanh %4 : vector<64x256xf32>
    %6 = vector.extract_strided_slice %5 {offsets = [0, 0], sizes = [64, 128], strides = [1, 1]} : vector<64x256xf32> to vector<64x128xf32>
    %7 = vector.shape_cast %6 : vector<64x128xf32> to vector<8x8x128xf32>
    %8 = vector.extract_strided_slice %5 {offsets = [0, 128], sizes = [64, 128], strides = [1, 1]} : vector<64x256xf32> to vector<64x128xf32>
    %9 = vector.shape_cast %8 : vector<64x128xf32> to vector<8x8x128xf32>
    %c0_7 = arith.constant 0 : index
    %c0_8 = arith.constant 0 : index
    %10 = vector.load %arg5[%c0_7, %c0_8] : memref<1x128xf32, #tpu.memory_space<vmem>>, vector<1x128xf32>
    %11 = vector.shape_cast %10 : vector<1x128xf32> to vector<1x1x128xf32>
    %12 = vector.broadcast %11 : vector<1x1x128xf32> to vector<8x8x128xf32>
    %13 = arith.mulf %7, %12 : vector<8x8x128xf32>
    %cst_9 = arith.constant dense<0.000000e+00> : vector<8x8xf32>
    %14 = vector.multi_reduction <add>, %13, %cst_9 [2] : vector<8x8x128xf32> to vector<8x8xf32>
    %c0_10 = arith.constant 0 : index
    %c0_11 = arith.constant 0 : index
    %15 = vector.load %arg9[%c0_10, %c0_11] : memref<1x1xf32, #tpu.memory_space<vmem>>, vector<1x1xf32>
    %16 = vector.broadcast %15 : vector<1x1xf32> to vector<8x8xf32>
    %17 = arith.addf %14, %16 : vector<8x8xf32>
    %18 = vector.broadcast %2 : vector<8x1x128xf32> to vector<8x8x128xf32>
    %19 = arith.mulf %9, %18 : vector<8x8x128xf32>
    %cst_12 = arith.constant dense<0.000000e+00> : vector<8x8xf32>
    %20 = vector.multi_reduction <add>, %19, %cst_12 [2] : vector<8x8x128xf32> to vector<8x8xf32>
    %21 = arith.mulf %17, %20 : vector<8x8xf32>
    %22 = tpu.iota {dimensions = array<i32: 1>} : vector<8x8xi32>
    %c0_13 = arith.constant 0 : index
    %c0_14 = arith.constant 0 : index
    %23 = vector.load %arg1[%c0_13, %c0_14] : memref<8x1xi32, #tpu.memory_space<vmem>>, vector<8x1xi32>
    %24 = vector.broadcast %23 : vector<8x1xi32> to vector<8x8xi32>
    %25 = arith.cmpi slt, %22, %24 : vector<8x8xi32>
    %cst_15 = arith.constant -1.000000e+09 : f32
    %26 = vector.broadcast %cst_15 : f32 to vector<8x8xf32>
    %27 = arith.select %25, %21, %26 : vector<8x8xi1>, vector<8x8xf32>
    %cst_16 = arith.constant dense<0xFF800000> : vector<8xf32>
    %28 = vector.multi_reduction <maximumf>, %27, %cst_16 [1] : vector<8x8xf32> to vector<8xf32>
    %29 = vector.shape_cast %28 : vector<8xf32> to vector<8x1xf32>
    %30 = vector.broadcast %29 : vector<8x1xf32> to vector<8x8xf32>
    %31 = arith.subf %27, %30 : vector<8x8xf32>
    %32 = math.exp %31 : vector<8x8xf32>
    %cst_17 = arith.constant dense<0.000000e+00> : vector<8xf32>
    %33 = vector.multi_reduction <add>, %32, %cst_17 [1] : vector<8x8xf32> to vector<8xf32>
    %34 = vector.shape_cast %33 : vector<8xf32> to vector<8x1xf32>
    %35 = vector.broadcast %34 : vector<8x1xf32> to vector<8x8xf32>
    %36 = arith.divf %32, %35 : vector<8x8xf32>
    %37 = vector.shape_cast %36 : vector<8x8xf32> to vector<8x8x1xf32>
    %38 = vector.broadcast %37 : vector<8x8x1xf32> to vector<8x8x32xf32>
    %39 = arith.mulf %38, %0 : vector<8x8x32xf32>
    %cst_18 = arith.constant dense<0.000000e+00> : vector<8x32xf32>
    %40 = vector.multi_reduction <add>, %39, %cst_18 [1] : vector<8x8x32xf32> to vector<8x32xf32>
    %c0_19 = arith.constant 0 : index
    %c0_20 = arith.constant 0 : index
    %41 = vector.load %arg6[%c0_19, %c0_20] : memref<32x8xf32, #tpu.memory_space<vmem>>, vector<32x8xf32>
    %cst_21 = arith.constant dense<0.000000e+00> : vector<8x8xf32>
    %42 = tpu.matmul %40, %41, %cst_21 {dimension_numbers = #tpu.dot_dimension_numbers<[1], [0], [0], [1], [0, 0, 1, 1], [], []>} : vector<8x32xf32>, vector<32x8xf32>, vector<8x8xf32> -> vector<8x8xf32>
    %43 = vector.shape_cast %2 : vector<8x1x128xf32> to vector<8x128xf32>
    %c0_22 = arith.constant 0 : index
    %c0_23 = arith.constant 0 : index
    %44 = vector.load %arg7[%c0_22, %c0_23] : memref<128x8xf32, #tpu.memory_space<vmem>>, vector<128x8xf32>
    %cst_24 = arith.constant dense<0.000000e+00> : vector<8x8xf32>
    %45 = tpu.matmul %43, %44, %cst_24 {dimension_numbers = #tpu.dot_dimension_numbers<[1], [0], [0], [1], [0, 0, 1, 1], [], []>} : vector<8x128xf32>, vector<128x8xf32>, vector<8x8xf32> -> vector<8x8xf32>
    %46 = arith.addf %42, %45 : vector<8x8xf32>
    %c0_25 = arith.constant 0 : index
    %c0_26 = arith.constant 0 : index
    %47 = vector.load %arg8[%c0_25, %c0_26] : memref<1x8xf32, #tpu.memory_space<vmem>>, vector<1x8xf32>
    %48 = vector.broadcast %47 : vector<1x8xf32> to vector<8x8xf32>
    %49 = arith.addf %46, %48 : vector<8x8xf32>
    %cst_27 = arith.constant dense<0xFF800000> : vector<8xf32>
    %50 = vector.multi_reduction <maximumf>, %49, %cst_27 [1] : vector<8x8xf32> to vector<8xf32>
    %51 = vector.shape_cast %50 : vector<8xf32> to vector<8x1xf32>
    %52 = vector.broadcast %51 : vector<8x1xf32> to vector<8x8xf32>
    %53 = arith.subf %49, %52 : vector<8x8xf32>
    %54 = math.exp %53 : vector<8x8xf32>
    %cst_28 = arith.constant dense<0.000000e+00> : vector<8xf32>
    %55 = vector.multi_reduction <add>, %54, %cst_28 [1] : vector<8x8xf32> to vector<8xf32>
    %56 = vector.shape_cast %55 : vector<8xf32> to vector<8x1xf32>
    %57 = vector.broadcast %56 : vector<8x1xf32> to vector<8x8xf32>
    %58 = arith.divf %54, %57 : vector<8x8xf32>
    %59 = tpu.concatenate %58, %36 in 1 : vector<8x8xf32>, vector<8x8xf32> -> vector<8x16xf32>
    %c0_29 = arith.constant 0 : index
    %c0_30 = arith.constant 0 : index
    %60 = vector.load %arg10[%c0_29, %c0_30] : memref<8x16xf32, #tpu.memory_space<vmem>>, vector<8x16xf32>
    tpu.vector_store %arg10[%c0_29, %c0_30], %59 {strides = array<i32>} : memref<8x16xf32, #tpu.memory_space<vmem>>, vector<8x16xf32>,
    return
  }
  func.func @transform_0(%arg0: i32) -> (i32, i32) {
    %c0_i32 = arith.constant 0 : i32
    %c0_i32_0 = arith.constant 0 : i32
    return %arg0, %c0_i32 : i32, i32
  }
  func.func @transform_1(%arg0: i32) -> (i32, i32, i32) {
    %c0_i32 = arith.constant 0 : i32
    %c0_i32_0 = arith.constant 0 : i32
    %c0_i32_1 = arith.constant 0 : i32
    return %arg0, %c0_i32, %c0_i32_0 : i32, i32, i32
  }
  func.func @transform_2(%arg0: i32) -> (i32, i32, i32) {
    %c0_i32 = arith.constant 0 : i32
    %c0_i32_0 = arith.constant 0 : i32
    %c0_i32_1 = arith.constant 0 : i32
    return %arg0, %c0_i32, %c0_i32_0 : i32, i32, i32
  }
  func.func @transform_3(%arg0: i32) -> (i32, i32) {
    %c0_i32 = arith.constant 0 : i32
    %c0_i32_0 = arith.constant 0 : i32
    %c0_i32_1 = arith.constant 0 : i32
    return %c0_i32, %c0_i32_0 : i32, i32
  }
  func.func @transform_4(%arg0: i32) -> (i32, i32) {
    %c0_i32 = arith.constant 0 : i32
    %c0_i32_0 = arith.constant 0 : i32
    %c0_i32_1 = arith.constant 0 : i32
    return %c0_i32, %c0_i32_0 : i32, i32
  }
  func.func @transform_5(%arg0: i32) -> (i32, i32) {
    %c0_i32 = arith.constant 0 : i32
    %c0_i32_0 = arith.constant 0 : i32
    %c0_i32_1 = arith.constant 0 : i32
    return %c0_i32, %c0_i32_0 : i32, i32
  }
  func.func @transform_6(%arg0: i32) -> (i32, i32) {
    %c0_i32 = arith.constant 0 : i32
    %c0_i32_0 = arith.constant 0 : i32
    %c0_i32_1 = arith.constant 0 : i32
    return %c0_i32, %c0_i32_0 : i32, i32
  }
  func.func @transform_7(%arg0: i32) -> (i32, i32) {
    %c0_i32 = arith.constant 0 : i32
    %c0_i32_0 = arith.constant 0 : i32
    %c0_i32_1 = arith.constant 0 : i32
    return %c0_i32, %c0_i32_0 : i32, i32
  }
  func.func @transform_8(%arg0: i32) -> (i32, i32) {
    %c0_i32 = arith.constant 0 : i32
    %c0_i32_0 = arith.constant 0 : i32
    %c0_i32_1 = arith.constant 0 : i32
    return %c0_i32, %c0_i32_0 : i32, i32
  }
  func.func @transform_9(%arg0: i32) -> (i32, i32) {
    %c0_i32 = arith.constant 0 : i32
    %c0_i32_0 = arith.constant 0 : i32
    return %arg0, %c0_i32 : i32, i32
  }
}

</mosaic_0001>

<bundles_post_ra>
// kernel: tpu_custom_call.1
= control target key start
LH: loop header
LB: loop body
LE: loop exit
PB: predicated region body
PF: predicated region fallthrough
CT: control target
= control target key end

     0   :  { %s2099_s0 = inlined_call_operand.vmem [shape: s32[16,1], index: 0, kind: input, shape index: {}]   ;;  %s2100_s1 = inlined_call_operand.vmem [shape: f32[16,8,32], index: 1, kind: input, shape index: {}]   ;;  %s2101_s2 = inlined_call_operand.hbm [shape: f32[16,1,128], index: 2, kind: input, shape index: {}]   ;;  %s2102_s3 = inlined_call_operand.vmem [shape: f32[32,256], index: 3, kind: input, shape index: {}]   ;;  %s2103_s4 = inlined_call_operand.vmem [shape: f32[1,128], index: 4, kind: input, shape index: {}]   ;;  %s2104_s5 = inlined_call_operand.vmem [shape: f32[32,8], index: 5, kind: input, shape index: {}]   ;;  %s2105_s6 = inlined_call_operand.vmem [shape: f32[128,8], index: 6, kind: input, shape index: {}]   ;;  %s2106_s7 = inlined_call_operand.vmem [shape: f32[1,8], index: 7, kind: input, shape index: {}]   ;;  %s2107_s8 = inlined_call_operand.<no memory space> [shape: f32[1,1], index: 8, kind: input, shape index: {}]   ;;  %s2108_s9 = inlined_call_operand.hbm [shape: f32[16,16], index: 9, kind: output, shape index: {}]  }
   0x1   :  { %2111 = sst [smem:[#allocation9_spill]] %s2101_s2  ;;  %v14_v0 = vstv %s2107_s8 }
   0x2   :  { %15 = vst [vmem:[#allocation2] sm:$0x1] %v14_v0 }
   0x3   :  { %16 = vsyncpa [#allocation4], 0 }
   0x4   :  { %18 = vsyncpa [#allocation4 + $0x1], 0 }
   0x5   :  { %19 = vsyncpa [#allocation5], 0 }
   0x6   :  { %21 = vsyncpa [#allocation5 + $0x1], 0  ;;  %s1648_s11 = smov 0   ;;  %s1650_s12 = smov 0  }
   0x7   :  { %s1652_s13 = smov 0   ;;  %s1654_s14 = smov 0  }
   0x8 LB: > { %s1669_s8 = sadd.s32 4294967295, %s1583_s14   ;;  %s1256_s15 = sadd.s32 4294967294, %s1583_s14   ;;  %s1583_s14 = sphi %s1654_s14, %s2125_s14   ;;  %s1579_s13 = sphi %s1652_s13, %s2124_s13   ;;  %s1575_s12 = sphi %s1650_s12, %s2123_s12   ;;  %s1571_s11 = sphi %s1648_s11, %s2122_s11  }
   0x9   : > { %s1673_s16 = sadd.s32 1, %s1583_s14   ;;  %s86_s17 = sadd.s32 1, %s1579_s13 }
   0xa   : > { %s83_s18 = ssub.s32 %s1583_s14, %s1673_s16  ;;  %p93_p0 = scmp.ne.s32.totalorder %s1579_s13, %s1575_s12 }
   0xb   : > { %p84_p1 = scmp.eq.s32.totalorder %s83_s18, 0  ;;  %p94_p2 = scmp.eq.s32.totalorder %s1583_s14, 0 }
   0xc   : > { %p99_p3 = scmp.ne.s32.totalorder %s1575_s12, %s1571_s11  ;;  %p100_p4 = scmp.eq.s32.totalorder %s1669_s8, 0 }
   0xd   : > { %s1685_s19 = scalar_select %p84_p1, %s1579_s13, %s86_s17  }
   0xe   : > { %p1687_p5 = por %p94_p2, %p93_p0  ;;  %p1691_p6 = por %p100_p4, %p99_p3 }
   0xf   : > { %p249_p7 = scmp.eq.s32.totalorder %s1669_s8, 1  ;;  %p255_p8 = scmp.eq.s32.totalorder %s1256_s15, 1 }
  0x10   : > { %p1403_p10 = scmp.lt.s32.totalorder %s1583_s14, 2  ;;  %s309_s24 = sand.u32 1, %s1579_s13  }
  0x11   : > { %p1698_p11 = por %p249_p7, %p93_p0  ;;  %p1702_p12 = por %p255_p8, %p99_p3 }
  0x12   : > { %s1284_s25 = sshll.u32 %s1583_s14, 7  ;;  %s1259_s26 = sshll.u32 %s309_s24, 3 }
  0x13   : > { %s2114_s22 = scalar_select %p1698_p11, 1, 0 }
  0x14   : > { %s2115_s23 = scalar_select %p1702_p12, 1, 0 }
  0x15   : > { %s2116_s2 = sld [smem:[#allocation9_spill]]  ;;  %s313_s30 = scalar_lea.vmem [#allocation3], %s1259_s26 }
  0x16   : > { %s320_s10 = sshll.u32 %s313_s30, 4  ;;  %p1715_p13 = pnand %p1403_p10, %p1687_p5  ;;  %s1719_s10 = int_to_ptr.vmem [resolvable:$true] %s320_s10 }
  0x17   : > { %s1721_s17 = scalar_lea.sflag [#allocation4], %s309_s24 }
  0x18   : > { %p1489_p1 = pneg %p1715_p13 }
  0x1b   : > { %s1711_s29 = scalar_lea.hbm %s2116_s2, %s1284_s25  ;;  %s1492_s26 = scalar_lea.hbm %s2116_s2, 256 }
  0x1c   : > { %s1487_s18 = scalar_lea.hbm %s1711_s29, 128  ;;  %p1493_p4 = scmp.lt.u32.totalorder %s1711_s29, %s2116_s2 }
  0x1d   : > { %p1488_p0 = scmp.ne.s32.totalorder %s1711_s29, %s1487_s18  ;;  %p1494_p5 = scmp.lt.u32.totalorder %s1492_s26, %s1487_s18 }
  0x1e   : > { %p1496_p8 = scmp.lt.u32.totalorder %s1487_s18, %s1711_s29 }
  0x1f   : > { %p1490_p2 = pnand %p1489_p1, %p1488_p0  ;;  %p1495_p7 = por %p1494_p5, %p1493_p4 }
  0x21   : > { %p1491_p3 = pneg %p1490_p2  ;;  %p1497_p10 = por %p1496_p8, %p1495_p7 }
  0x23   : > { %p1498_p9 = pnand %p1497_p10, %p1491_p3 }
  0x25   : > { %1501 = shalt.err (!%p1498_p9)
}
  0x26   : > { %s1502_s24 = scalar_lea.vmem %s1719_s10, 128  ;;  %s1585_s30 = smov [#allocation3]  }
  0x27   : > { %p1503_p0 = scmp.ne.s32.totalorder %s1719_s10, %s1502_s24  ;;  %s1507_s25 = sshll.u32 %s1585_s30, 4  ;;  %s1508_s25 = int_to_ptr.vmem [resolvable:$false] %s1507_s25 }
  0x28   : > { %s1509_s20 = scalar_lea.vmem %s1508_s25, 256  ;;  %p1510_p11 = scmp.lt.s32.totalorder %s1719_s10, %s1508_s25 }
  0x29   : > { %p1505_p2 = pnand %p1503_p0, %p1489_p1  ;;  %p1511_p4 = scmp.lt.s32.totalorder %s1509_s20, %s1502_s24 }
  0x2b   : > { %p1506_p12 = pneg %p1505_p2  ;;  %p1512_p5 = por %p1511_p4, %p1510_p11 }
  0x2d   : > { %p1513_p7 = pnand %p1512_p5, %p1506_p12 }
  0x2f   : > { %1516 = shalt.err (!%p1513_p7)
}
  0x30   : > { %s1586_s18 = smov 16   ;;  %s1587_s26 = smov 1  }
  0x31   : > { %1398 = dma.hbm_to_vmem [thread:$0]  (!%p1715_p13), %s1711_s29, 128, %s1719_s10, %s1721_s17, %s1586_s18, %s1586_s18, %s1587_s26  }
  0x32   : > { %p1262_p9 = scmp.ge.s32.totalorder %s1583_s14, 1  ;;  %p328_p1 = scmp.lt.s32.totalorder %s1583_s14, 3 }
  0x34   : > { %p329_p3 = pnand %p1262_p9, %p328_p1 }
  0x35   : > { %s1752_s27 = sand.u32 (!%p329_p3), 1, %s1575_s12  }
  0x36   : > { %332 = sbr.rel (%p329_p3) target bundleno = 1503 (0x5df), region = 56  ;;  %s2110_s28 = sshll.u32 (!%p329_p3), %s1752_s27, 3 }
  0x37   : > { %s335_s24 = scalar_lea.sflag (!%p329_p3), [#allocation4], %s1752_s27  ;;  %s1758_s30 = scalar_lea.vmem (!%p329_p3), [#allocation3], %s2110_s28 }
  0x3d   : > { %1562 = dma.done.wait (%p1691_p6), %s335_s24, 128  }
  0x3e   : > { %1564 = vsyncadd (%p1691_p6), %s335_s24, 4294967168  ;;  %s1266_s29 = sshll.u32 %s1669_s8, 3  ;;  %v1588_v1 = vmov 0.0   ;;  %v410_v2 = vld [vmem:[%s2102_s3 + $0x8] sm:$0xff]  ;;  %v412_v3 = vld [vmem:[%s2102_s3 + $0x18] sm:$0xff]  ;;  %vm417_vm0 = vcmask 261120   ;;  %v628_v36 = vlaneseq }
  0x3f   : > { %506 = vmatprep.mubr.f32.mxu0 %v1588_v1  ;;  %p387_p11 = scmp.lt.s32.totalorder %s1266_s29, 15  ;;  %v409_v4 = vld [vmem:[%s2102_s3] sm:$0xff]  ;;  %v1353_v5 = vpack.c.bf16 %v412_v3, %v410_v2  ;;  %v411_v6 = vld [vmem:[%s2102_s3 + $0x10] sm:$0xff]  ;;  %v414_v7 = vld [vmem:[%s2102_s3 + $0x28] sm:$0xff]  ;;  %v1589_v34 = vmov 0   ;;  %p382_p6 = scmp.lt.s32.totalorder %s1669_s8, 1 }
  0x40   : > { %v416_v8 = vld [vmem:[%s2102_s3 + $0x38] sm:$0xff]  ;;  %v1355_v9 = vpack.c.bf16 %v411_v6, %v409_v4  ;;  %v413_v11 = vld [vmem:[%s2102_s3 + $0x20] sm:$0xff]  ;;  %v415_v12 = vld [vmem:[%s2102_s3 + $0x30] sm:$0xff]  ;;  %1445 = vset.pattern.permute.xlu0 %v1589_v34  ;;  %1446 = vset.pattern.permute.xlu1 %v1589_v34  ;;  %v1865_v39 = vshrl.u32 %v628_v36, 7  ;;  %vm747_vm1 = vcmask 1041409   ;;  %vm749_vm2 = vcmask 1042434  }
  0x41   : > { %s2127_s29 = smov (!%p387_p11, %s1266_s29), 15  ;;  %v1357_v10 = vpack.c.bf16 %v416_v8, %v414_v7  ;;  %1354 = vmatprep.subr.bf16.mxu0 %v1353_v5  ;;  %v1359_v13 = vpack.c.bf16 %v415_v12, %v413_v11  ;;  %v1833_v22 = vld [vmem:[%s1758_s30] sm:$0x1]  ;;  %v1836_v23 = vld [vmem:[%s1758_s30 + $0x1] sm:$0x1]  ;;  %vm751_vm3 = vcmask 1043459  }
  0x42   : > { %s1267_s18 = sshll.u32 %s2127_s29, 3  ;;  %1356 = vmatpush1.bf16.msra.mxu0 %v1355_v9  ;;  %v915_v24 = vcombine.low %v1833_v22, %v1836_v23  ;;  %v1841_v25 = vld [vmem:[%s1758_s30 + $0x2] sm:$0x1]  ;;  %v1844_v26 = vld [vmem:[%s1758_s30 + $0x3] sm:$0x1]  ;;  %v1868_v42 = vsub.s32 0, %v1865_v39 }
  0x43   : > { %1358 = vmatprep.subr.bf16.mxu0 %v1357_v10  ;;  %s390_s2 = scalar_lea.vmem %s2100_s1, %s1267_s18  ;;  %v916_v27 = vcombine.low %v1841_v25, %v1844_v26  ;;  %v1849_v28 = vld [vmem:[%s1758_s30 + $0x4] sm:$0x1]  ;;  %v1852_v29 = vld [vmem:[%s1758_s30 + $0x5] sm:$0x1]  ;;  %v1857_v31 = vld [vmem:[%s1758_s30 + $0x6] sm:$0x1] }
  0x44   : > { %v1793_v14 = vld [vmem:[%s390_s2] sm:$0xff]  ;;  %v1798_v15 = vld [vmem:[%s390_s2 + $0x8] sm:$0xff]  ;;  %v1803_v16 = vld [vmem:[%s390_s2 + $0x10] sm:$0xff]  ;;  %v917_v30 = vcombine.low %v1849_v28, %v1852_v29  ;;  %v631_v48 = vrot.slane %v1833_v22, %v1868_v42  ;;  %v635_v51 = vrot.slane %v1836_v23, %v1868_v42  ;;  %v639_v63 = vrot.slane %v1841_v25, %v1868_v42  ;;  %s383_s26 = scalar_select %p382_p6, %s1669_s8, 1 }
  0x45   : > { %v1808_v17 = vld [vmem:[%s390_s2 + $0x18] sm:$0xff]  ;;  %v1813_v18 = vld [vmem:[%s390_s2 + $0x20] sm:$0xff]  ;;  %v1818_v19 = vld [vmem:[%s390_s2 + $0x28] sm:$0xff]  ;;  %v643_v11 = vrot.slane %v1844_v26, %v1868_v42  ;;  %vm753_vm4 = vcmask 1044484   ;;  %vm755_vm5 = vcmask 1045509   ;;  %vm757_vm6 = vcmask 1046534  }
  0x46   : > { %1360 = vmatpush1.bf16.msra.mxu0 %v1359_v13  ;;  %v1823_v20 = vld [vmem:[%s390_s2 + $0x30] sm:$0xff]  ;;  %v1828_v21 = vld [vmem:[%s390_s2 + $0x38] sm:$0xff]  ;;  %v1873_v44 = vld [vmem:[%s2103_s4] ss:$0 sm:$0xff]  ;;  %s1265_s24 = sshll.u32 %s383_s26, 3  ;;  %vm759_vm7 = vcmask 1047559  }
  0x47   : > { %v1860_v32 = vld [vmem:[%s1758_s30 + $0x7] sm:$0x1]  ;;  %s385_s17 = scalar_lea.vmem %s2099_s0, %s1265_s24  ;;  %vm763_vm9 = vcmask 64512   ;;  %v914_v26 = vld [vmem:[%s2105_s6 + $0x78] sm:$0xff]  ;;  %vm1592_vm10 = vmmov 0   ;;  %s1593_s28 = smov 8  }
  0x48   : > { %v918_v33 = vcombine.low %v1857_v31, %v1860_v32  ;;  %v912_v22 = vld [vmem:[%s2105_s6 + $0x68] sm:$0xff]  ;;  %v913_v25 = vld [vmem:[%s2105_s6 + $0x70] sm:$0xff]  ;;  %1339 = vmatprep.mubr.msk.f32.mxu1 %vm1592_vm10, %v1588_v1  ;;  %s1281_s21 = sshll.u32 %s1669_s8, 7  ;;  %s2118_s2 = sshll.u32 %s1752_s27, 3  ;;  %vm1146_vm11 = vcmask 130048  }
  0x49   : > { %1268 = vmatmul.mubr.msk.f32.vlgmr.msra.gmra.mrb[0].mxu0 %vm417_vm0, %v1793_v14  ;;  %s381_s30 = scalar_lea.vmem [#allocation6], %s2118_s2  ;;  %s2054_s10 = scalar_lea.hbm %s2108_s9, %s1281_s21 }
  0x4a   : > { %512 = vmatprep.mubr.f32.mxu0 %v1588_v1  ;;  %s1162_s29 = sshll.u32 %s381_s30, 4  ;;  %s1149_s8 = scalar_lea.sflag [#allocation5], %s1752_s27  ;;  %s2056_s29 = int_to_ptr.vmem [resolvable:$true] %s1162_s29 }
  0x4b   : > { %s1517_s15 = scalar_lea.vmem %s2056_s29, 128  ;;  %p2119_p13 = scmp.ne.s32.totalorder %s2114_s22, 0 }
  0x4c   : > { %p1518_p12 = scmp.ne.s32.totalorder %s2056_s29, %s1517_s15 }
  0x4d   : > { %1269 = vmatmul.mubr.msk.f32.gmra.mrb[2].mxu0 %vm417_vm0, %v1798_v15 }
  0x4e   : > { %518 = vmatprep.mubr.f32.mxu0 %v1588_v1  ;;  %p1519_p8 = pnand %p1518_p12, %p2119_p13 }
  0x50   : > { %p1520_p10 = pneg %p1519_p8 }
  0x51   : > { %1270 = vmatmul.mubr.msk.f32.gmra.mrb[4].mxu0 %vm417_vm0, %v1803_v16 }
  0x52   : > { %524 = vmatprep.mubr.f32.mxu0 %v1588_v1 }
  0x55   : > { %1271 = vmatmul.mubr.msk.f32.gmra.mrb[6].mxu0 %vm417_vm0, %v1808_v17 }
  0x56   : > { %530 = vmatprep.mubr.f32.mxu0 %v1588_v1 }
  0x59   : > { %1272 = vmatmul.mubr.msk.f32.gmra.mrb[8].mxu0 %vm417_vm0, %v1813_v18 }
  0x5a   : > { %536 = vmatprep.mubr.f32.mxu0 %v1588_v1 }
  0x5d   : > { %1273 = vmatmul.mubr.msk.f32.gmra.mrb[10].mxu0 %vm417_vm0, %v1818_v19 }
  0x5e   : > { %542 = vmatprep.mubr.f32.mxu0 %v1588_v1 }
  0x61   : > { %1274 = vmatmul.mubr.msk.f32.gmra.mrb[12].mxu0 %vm417_vm0, %v1823_v20 }
  0x62   : > { %548 = vmatprep.mubr.f32.mxu0 %v1588_v1 }
  0x65   : > { %1275 = vmatmul.mubr.msk.f32.gmra.mrb[14].mxu0 %vm417_vm0, %v1828_v21 }
  0x66   : > { %1350 = vmatprep.mubr.msk.f32.mxu0 %vm1592_vm10, %v1588_v1 }
 0x11c   : > { %v508_v35 = vpop.f32.mrb[0].mxu0 }
 0x11d   : > { %1447 = vtanh.f32 %v508_v35  ;;  %v510_v37 = vpop.f32.mrb[1].mxu0 }
 0x11e   : > { %1449 = vtanh.f32 %v510_v37  ;;  %v647_v37 = vrot.slane %v1849_v28, %v1868_v42 }
 0x120   : > { %v514_v38 = vpop.f32.mrb[2].mxu0 }
 0x121   : > { %v516_v40 = vpop.f32.mrb[3].mxu0 }
 0x122   : > { %1451 = vtanh.f32 %v516_v40 }
 0x123   : > { %1453 = vtanh.f32 %v514_v38 }
 0x124   : > { %v520_v41 = vpop.f32.mrb[4].mxu0 }
 0x125   : > { %1455 = vtanh.f32 %v520_v41  ;;  %v522_v43 = vpop.f32.mrb[5].mxu0 }
 0x126   : > { %1457 = vtanh.f32 %v522_v43 }
 0x127   : > { %v1448_v45 = vpop.eup %1447 }
 0x128   : > { %v526_v46 = vpop.f32.mrb[6].mxu0  ;;  %v578_v47 = vmul.f32 %v1448_v45, %v1873_v44  ;;  %v1450_v49 = vpop.eup %1449  ;;  %v651_v45 = vrot.slane %v1852_v29, %v1868_v42  ;;  %v897_v29 = vld [vmem:[%s2104_s5 + $0x10] sm:$0xff] }
 0x129   : > { %v528_v50 = vpop.f32.mrb[7].mxu0  ;;  %1459 = vtanh.f32 %v526_v46  ;;  %v668_v54 = vmul.f32 %v1450_v49, %v631_v48 }
 0x12a   : > { %586 = vadd.xlane.f32.xlu0 %v578_v47 }
 0x12c   : > { %v1452_v52 = vpop.eup %1451  ;;  %v532_v53 = vpop.f32.mrb[8].mxu0 }
 0x12d   : > { %v1454_v55 = vpop.eup %1453  ;;  %1461 = vtanh.f32 %v532_v53  ;;  %v534_v56 = vpop.f32.mrb[9].mxu0  ;;  %v669_v57 = vmul.f32 %v1452_v52, %v635_v51  ;;  %v659_v53 = vrot.slane %v1860_v32, %v1868_v42 }
 0x12e   : > { %676 = vadd.xlane.f32.xlu0 %v668_v54  ;;  %1463 = vtanh.f32 %v528_v50  ;;  %v579_v60 = vmul.f32 %v1454_v55, %v1873_v44  ;;  %v655_v50 = vrot.slane %v1857_v31, %v1868_v42  ;;  %v1383_v31 = vpack.c.bf16 %v914_v26, %v913_v25 }
 0x12f   : > { %v1456_v58 = vpop.eup %1455  ;;  %678 = vadd.xlane.f32.xlu1 %v669_v57 }
 0x130   : > { %v538_v59 = vpop.f32.mrb[10].mxu0  ;;  %v580_v61 = vmul.f32 %v1456_v58, %v1873_v44  ;;  %v1458_v0 = vpop.eup %1457 }
 0x131   : > { %1465 = vtanh.f32 %v538_v59  ;;  %v540_v62 = vpop.f32.mrb[11].mxu0  ;;  %v670_v4 = vmul.f32 %v1458_v0, %v639_v63 }
 0x132   : > { %588 = vadd.xlane.f32.xlu0 %v579_v60  ;;  %1467 = vtanh.f32 %v534_v56  ;;  %v1277_v56 = vld [vmem:[#allocation2] ss:$0 sm:$0xff] }
 0x133   : > { %590 = vadd.xlane.f32.xlu1 %v580_v61  ;;  %v1460_v5 = vpop.eup %1459 }
 0x134   : > { %v544_v2 = vpop.f32.mrb[12].mxu0  ;;  %v581_v10 = vmul.f32 %v1460_v5, %v1873_v44 }
 0x135   : > { %1469 = vtanh.f32 %v544_v2  ;;  %v546_v3 = vpop.f32.mrb[13].mxu0 }
 0x136   : > { %1471 = vtanh.f32 %v540_v62 }
 0x137   : > { %v1462_v6 = vpop.eup %1461  ;;  %680 = vadd.xlane.f32.xlu1 %v670_v4 }
 0x138   : > { %v550_v7 = vpop.f32.mrb[14].mxu0  ;;  %v582_v8 = vmul.f32 %v1462_v6, %v1873_v44  ;;  %v1464_v12 = vpop.eup %1463 }
 0x139   : > { %1473 = vtanh.f32 %v550_v7  ;;  %v552_v9 = vpop.f32.mrb[15].mxu0  ;;  %v671_v35 = vmul.f32 %v1464_v12, %v643_v11 }
 0x13a   : > { %594 = vadd.xlane.f32.xlu0 %v582_v8  ;;  %1475 = vtanh.f32 %v546_v3  ;;  %v701_v8 = vand.u32 127, %v628_v36 }
 0x13b   : > { %v1466_v13 = vpop.eup %1465  ;;  %592 = vadd.xlane.f32.xlu1 %v581_v10  ;;  %1477 = vtanh.f32 %v552_v9 }
 0x13c   : > { %v583_v34 = vmul.f32 %v1466_v13, %v1873_v44  ;;  %v1468_v38 = vpop.eup %1467  ;;  %v717_v11 = vsub.s32 %v701_v8, %v1865_v39 }
 0x13d   : > { %v672_v43 = vmul.f32 %v1468_v38, %v647_v37 }
 0x13e   : > { %596 = vadd.xlane.f32.xlu0 %v583_v34 }
 0x13f   : > { %v1470_v40 = vpop.eup %1469  ;;  %682 = vadd.xlane.f32.xlu1 %v671_v35 }
 0x140   : > { %v584_v41 = vmul.f32 %v1470_v40, %v1873_v44  ;;  %v1472_v46 = vpop.eup %1471 }
 0x141   : > { %v673_v49 = vmul.f32 %v1472_v46, %v651_v45 }
 0x142   : > { %598 = vadd.xlane.f32.xlu0 %v584_v41 }
 0x143   : > { %v1474_v47 = vpop.eup %1473  ;;  %684 = vadd.xlane.f32.xlu1 %v672_v43 }
 0x144   : > { %v585_v48 = vmul.f32 %v1474_v47, %v1873_v44  ;;  %v1476_v51 = vpop.eup %1475  ;;  %v702_v44 = vld [vmem:[%s385_s17] sm:$0xff]  ;;  %s1594_s17 = smov [#allocation6]  }
 0x145   : > { %v674_v52 = vmul.f32 %v1476_v51, %v655_v50  ;;  %v1478_v54 = vpop.eup %1477  ;;  %s1521_s25 = sshll.u32 %s1594_s17, 4  ;;  %s1522_s25 = int_to_ptr.vmem [resolvable:$false] %s1521_s25 }
 0x146   : > { %600 = vadd.xlane.f32.xlu0 %v585_v48  ;;  %v675_v55 = vmul.f32 %v1478_v54, %v659_v53  ;;  %s1523_s20 = scalar_lea.vmem %s1522_s25, 256  ;;  %p1524_p0 = scmp.lt.s32.totalorder %s2056_s29, %s1522_s25 }
 0x147   : > { %686 = vadd.xlane.f32.xlu1 %v673_v49  ;;  %p1525_p2 = scmp.lt.s32.totalorder %s1523_s20, %s1517_s15 }
 0x149   : > { %p1526_p4 = por %p1525_p2, %p1524_p0 }
 0x14b   : > { %688 = vadd.xlane.f32.xlu1 %v674_v52  ;;  %p1527_p5 = pnand %p1526_p4, %p1520_p10 }
 0x14f   : > { %690 = vadd.xlane.f32.xlu1 %v675_v55 }
 0x15c   : > { %609 = vperm.xlu0 %1445, %v1277_v56  }
 0x160   : > { %704 = vperm.xlu1 %1446, %v702_v44  }
 0x1b7   : > { %v587_v57 = vpop.xlane.xlu0 %586 }
 0x1bb   : > { %v677_v59 = vpop.xlane.xlu0 %676 }
 0x1bc   : > { %v679_v58 = vpop.xlane.xlu1 %678 }
 0x1bf   : > { %v589_v61 = vpop.xlane.xlu0 %588 }
 0x1c0   : > { %v591_v60 = vpop.xlane.xlu1 %590 }
 0x1c4   : > { %v681_v62 = vpop.xlane.xlu1 %680 }
 0x1c7   : > { %v595_v63 = vpop.xlane.xlu0 %594 }
 0x1c8   : > { %v593_v0 = vpop.xlane.xlu1 %592 }
 0x1cb   : > { %v597_v2 = vpop.xlane.xlu0 %596 }
 0x1cc   : > { %v683_v3 = vpop.xlane.xlu1 %682 }
 0x1cf   : > { %v599_v5 = vpop.xlane.xlu0 %598 }
 0x1d0   : > { %v685_v4 = vpop.xlane.xlu1 %684 }
 0x1d3   : > { %v601_v7 = vpop.xlane.xlu0 %600 }
 0x1d4   : > { %v687_v6 = vpop.xlane.xlu1 %686 }
 0x1d8   : > { %v689_v9 = vpop.xlane.xlu1 %688 }
 0x1db   : > { %v610_v10 = vpop.permute.xlu0 %609 }
 0x1dc   : > { %v612_v12 = vadd.f32 %v610_v10, %v587_v57  ;;  %v613_v13 = vadd.f32 %v610_v10, %v589_v61  ;;  %v614_v34 = vadd.f32 %v610_v10, %v591_v60  ;;  %v615_v35 = vadd.f32 %v610_v10, %v593_v0  ;;  %v691_v48 = vpop.xlane.xlu1 %690 }
 0x1dd   : > { %v619_v37 = vadd.f32 %v610_v10, %v601_v7  ;;  %v616_v38 = vadd.f32 %v610_v10, %v595_v63  ;;  %v617_v40 = vadd.f32 %v610_v10, %v597_v2  ;;  %v618_v41 = vadd.f32 %v610_v10, %v599_v5 }
 0x1de   : > { %v692_v43 = vmul.f32 %v677_v59, %v612_v12  ;;  %v693_v45 = vmul.f32 %v679_v58, %v613_v13  ;;  %v694_v46 = vmul.f32 %v681_v62, %v614_v34  ;;  %v695_v47 = vmul.f32 %v683_v3, %v615_v35  ;;  %v900_v13 = vld [vmem:[%s2105_s6 + $0x8] sm:$0xff] }
 0x1df   : > { %v696_v49 = vmul.f32 %v685_v4, %v616_v38  ;;  %v697_v36 = vmul.f32 %v687_v6, %v617_v40  ;;  %v698_v53 = vmul.f32 %v689_v9, %v618_v41  ;;  %v699_v54 = vmul.f32 %v691_v48, %v619_v37  ;;  %v901_v40 = vld [vmem:[%s2105_s6 + $0x10] sm:$0xff]  ;;  %v902_v41 = vld [vmem:[%s2105_s6 + $0x18] sm:$0xff] }
 0x1e0   : > { %v718_v50 = vrot.slane %v692_v43, %v717_v11  ;;  %v722_v51 = vrot.slane %v693_v45, %v717_v11  ;;  %v726_v52 = vrot.slane %v694_v46, %v717_v11  ;;  %v730_v55 = vrot.slane %v695_v47, %v717_v11  ;;  %v705_v44 = vpop.permute.xlu1 %704 }
 0x1e1   : > { %v734_v57 = vrot.slane %v696_v49, %v717_v11  ;;  %v738_v59 = vrot.slane %v697_v36, %v717_v11  ;;  %v742_v61 = vrot.slane %v698_v53, %v717_v11  ;;  %v746_v63 = vrot.slane %v699_v54, %v717_v11  ;;  %v899_v11 = vld [vmem:[%s2105_s6] sm:$0xff] }
 0x1e2   : > { %v748_v56 = vsel %vm747_vm1, %v722_v51, %v718_v50  ;;  %vm706_vm8 = vcmp.lt.s32.totalorder %v701_v8, %v705_v44  ;;  %v1362_v34 = vpack.c.bf16 %v900_v13, %v899_v11  ;;  %v1590_v35 = vmov 0.0|0.0   ;;  %v903_v36 = vld [vmem:[%s2105_s6 + $0x20] sm:$0xff]  ;;  %v904_v50 = vld [vmem:[%s2105_s6 + $0x28] sm:$0xff]  ;;  %v906_v44 = vld [vmem:[%s2105_s6 + $0x38] sm:$0xff] }
 0x1e3   : > { %v750_v58 = vsel %vm749_vm2, %v726_v52, %v748_v56  ;;  %1361 = vmatprep.subr.bf16.mxu1 %v1590_v35  ;;  %1385 = vmatprep.subr.bf16.mxu0 %v1590_v35  ;;  %v784_v37 = vsub.s32 1, %v1865_v39  ;;  %v1365_v45 = vpack.c.bf16 %v902_v41, %v901_v40  ;;  %v826_v48 = vsub.s32 7, %v1865_v39  ;;  %v905_v56 = vld [vmem:[%s2105_s6 + $0x30] sm:$0xff] }
 0x1e4   : > { %v752_v60 = vsel %vm751_vm3, %v730_v55, %v750_v58  ;;  %1363 = vmatpush3.bf16.msra.mxu1 %v1362_v34  ;;  %v791_v49 = vsub.s32 2, %v1865_v39  ;;  %v1368_v51 = vpack.c.bf16 %v904_v50, %v903_v36  ;;  %v798_v53 = vsub.s32 3, %v1865_v39 }
 0x1e5   : > { %v754_v62 = vsel %vm753_vm4, %v734_v57, %v752_v60  ;;  %1364 = vmatprep.subr.bf16.mxu1 %v1590_v35  ;;  %v1591_v54 = vmov 1966171168   ;;  %v1371_v57 = vpack.c.bf16 %v906_v44, %v905_v56  ;;  %v895_v60 = vld [vmem:[%s2104_s5] sm:$0xff] }
 0x1e6   : > { %v756_v0 = vsel %vm755_vm5, %v738_v59, %v754_v62  ;;  %v920_v55 = vunpack.c.l.s4 %v1591_v54  ;;  %v805_v59 = vsub.s32 4, %v1865_v39 }
 0x1e7   : > { %v758_v2 = vsel %vm757_vm6, %v742_v61, %v756_v0  ;;  %v896_v61 = vld [vmem:[%s2104_s5 + $0x8] sm:$0xff]  ;;  %v907_v0 = vld [vmem:[%s2105_s6 + $0x40] sm:$0xff] }
 0x1e8   : > { %v760_v3 = vsel %vm759_vm7, %v746_v63, %v758_v2  ;;  %1366 = vmatpush3.bf16.msra.mxu1 %v1365_v45  ;;  %v921_v62 = vunpack.c.0.s8 %v920_v55  ;;  %v1386_v63 = vpack.c.bf16 %v896_v61, %v895_v60  ;;  %v908_v2 = vld [vmem:[%s2105_s6 + $0x48] sm:$0xff] }
 0x1e9   : > { %v762_v4 = vsel %vm706_vm8, %v760_v3, -1e+09  ;;  %1367 = vmatprep.subr.bf16.mxu1 %v1590_v35  ;;  %v1374_v3 = vpack.c.bf16 %v908_v2, %v907_v0 }
 0x1ea   : > { %v764_v5 = vsel %vm763_vm9, %v762_v4, -inf  ;;  %1387 = vmatpush3.bf16.msra.mxu0 %v1386_v63 }
 0x1eb   : > { %765 = vmax.xlane.f32.xlu1 %v764_v5  ;;  %v812_v5 = vsub.s32 5, %v1865_v39  ;;  %1388 = vmatprep.subr.bf16.mxu0 %v1590_v35 }
 0x1ec   : > { %1369 = vmatpush3.bf16.msra.mxu1 %v1368_v51 }
 0x1ed   : > { %1370 = vmatprep.subr.bf16.mxu1 %v1590_v35 }
 0x1f0   : > { %1372 = vmatpush3.bf16.msra.mxu1 %v1371_v57 }
 0x1f1   : > { %1373 = vmatprep.subr.bf16.mxu1 %v1590_v35 }
 0x1f4   : > { %1375 = vmatpush3.bf16.msra.mxu1 %v1374_v3 }
 0x1f5   : > { %1376 = vmatprep.subr.bf16.mxu1 %v1590_v35 }
 0x278   : > { %v766_v6 = vpop.xlane.xlu1 %765 }
 0x279   : > { %v767_v7 = vsub.f32 %v762_v4, %v766_v6  ;;  %v924_v6 = vsub.s32 %v921_v62, %v1865_v39 }
 0x27b   : > { %v768_v9 = vmul.f32 1.442695, %v767_v7  ;;  %v909_v7 = vld [vmem:[%s2105_s6 + $0x50] sm:$0xff]  ;;  %v925_v11 = vrot.slane %v915_v24, %v924_v6  ;;  %v932_v13 = vrot.slane %v916_v27, %v924_v6  ;;  %v939_v34 = vrot.slane %v917_v30, %v924_v6  ;;  %v898_v30 = vld [vmem:[%s2104_s5 + $0x18] sm:$0xff] }
 0x27c   : > { %v1389_v32 = vpack.c.bf16 %v898_v30, %v897_v29 }
 0x27d   : > { %1479 = vpow2.f32 %v768_v9  ;;  %v910_v9 = vld [vmem:[%s2105_s6 + $0x58] sm:$0xff]  ;;  %v947_v27 = vcombine.low %v925_v11, %v932_v13 }
 0x27e   : > { %1390 = vmatpush3.bf16.msra.mxu0 %v1389_v32 }
 0x287   : > { %v1480_v10 = vpop.eup %1479 }
 0x288   : > { %v770_v12 = vsel %vm763_vm9, %v1480_v10, 0.0 }
 0x289   : > { %771 = vadd.xlane.f32.xlu0 %v770_v12 }
 0x316   : > { %v772_v8 = vpop.xlane.xlu0 %771 }
 0x317   : > { %1481 = vrcp.f32 %v772_v8  ;;  %v819_v8 = vsub.s32 6, %v1865_v39  ;;  %v911_v39 = vld [vmem:[%s2105_s6 + $0x60] sm:$0xff] }
 0x318   : > { %v1380_v23 = vpack.c.bf16 %v912_v22, %v911_v39 }
 0x321   : > { %v1482_v38 = vpop.eup %1481 }
 0x322   : > { %v1931_v43 = vmul.f32 %v1482_v38, %v1480_v10  ;;  %v1377_v10 = vpack.c.bf16 %v910_v9, %v909_v7 }
 0x324   : > { %v785_v46 = vrot.slane %v1931_v43, %v784_v37  ;;  %v778_v47 = vrot.slane %v1931_v43, %v1868_v42  ;;  %v827_v42 = vrot.slane %v1931_v43, %v826_v48  ;;  %v792_v52 = vrot.slane %v1931_v43, %v791_v49  ;;  %1378 = vmatpush3.bf16.msra.mxu1 %v1377_v10 }
 0x325   : > { %v799_v58 = vrot.slane %v1931_v43, %v798_v53  ;;  %v806_v4 = vrot.slane %v1931_v43, %v805_v59  ;;  %v813_v12 = vrot.slane %v1931_v43, %v812_v5  ;;  %v946_v37 = vrot.slane %v918_v33, %v924_v6  ;;  %1379 = vmatprep.subr.bf16.mxu1 %v1590_v35 }
 0x326   : > { %787 = vbcast.lane.b32.xlu0 %v785_v46, 256  ;;  %780 = vbcast.lane.b32.xlu1 %v778_v47, 256  ;;  %v820_v24 = vrot.slane %v1931_v43, %v819_v8  ;;  %v955_v33 = vrot.slane %v947_v27, %v924_v6 }
 0x327   : > { %v948_v28 = vcombine.low %v939_v34, %v946_v37 }
 0x328   : > { %1381 = vmatpush3.bf16.msra.mxu1 %v1380_v23 }
 0x329   : > { %1382 = vmatprep.subr.bf16.mxu1 %v1590_v35  ;;  %v962_v35 = vrot.slane %v948_v28, %v924_v6 }
 0x32a   : > { %829 = vbcast.lane.b32.xlu0 %v827_v42, 256  ;;  %794 = vbcast.lane.b32.xlu1 %v792_v52, 256 }
 0x32b   : > { %v963_v38 = vcombine.low %v955_v33, %v962_v35 }
 0x32c   : > { %1384 = vmatpush3.bf16.msra.mxu1 %v1383_v31 }
 0x32e   : > { %801 = vbcast.lane.b32.xlu1 %v799_v58, 256 }
 0x32f   : > { %1340 = vmatmul.mubr.f32.vlgmr.msra.gmra.mrb[0].mxu1 %v963_v38 }
 0x332   : > { %808 = vbcast.lane.b32.xlu1 %v806_v4, 256 }
 0x336   : > { %815 = vbcast.lane.b32.xlu1 %v813_v12, 256 }
 0x33a   : > { %822 = vbcast.lane.b32.xlu1 %v820_v24, 256 }
 0x398   : > { %v788_v40 = vpop.permute.xlu0 %787  ;;  %v781_v41 = vpop.permute.xlu1 %780 }
 0x399   : > { %v832_v45 = vmul.f32 %v788_v40, %v1798_v15  ;;  %v831_v46 = vmul.f32 %v781_v41, %v1793_v14 }
 0x39b   : > { %v846_v47 = vsel %vm417_vm0, %v832_v45, 0.0  ;;  %v839_v48 = vsel %vm417_vm0, %v831_v46, 0.0 }
 0x39c   : > { %v795_v49 = vpop.permute.xlu1 %794  ;;  %v830_v36 = vpop.permute.xlu0 %829  ;;  %v847_v51 = vrot.slane %v846_v47, 4  ;;  %v840_v1 = vrot.slane %v839_v48, 4 }
 0x39d   : > { %v833_v50 = vmul.f32 %v795_v49, %v1803_v16  ;;  %v838_v52 = vmul.f32 %v830_v36, %v1828_v21 }
 0x39e   : > { %v848_v55 = vadd.f32 %v847_v51, %v846_v47  ;;  %v841_v14 = vadd.f32 %v840_v1, %v839_v48 }
 0x39f   : > { %v853_v42 = vsel %vm417_vm0, %v833_v50, 0.0  ;;  %v888_v44 = vsel %vm417_vm0, %v838_v52, 0.0 }
 0x3a0   : > { %v854_v53 = vrot.slane %v853_v42, 4  ;;  %v802_v54 = vpop.permute.xlu1 %801  ;;  %v849_v60 = vrot.slane %v848_v55, 2  ;;  %v842_v61 = vrot.slane %v841_v14, 2  ;;  %v889_v62 = vrot.slane %v888_v44, 4 }
 0x3a1   : > { %v834_v15 = vmul.f32 %v802_v54, %v1808_v17 }
 0x3a2   : > { %v855_v57 = vadd.f32 %v854_v53, %v853_v42  ;;  %v850_v6 = vadd.f32 %v849_v60, %v848_v55  ;;  %v843_v7 = vadd.f32 %v842_v61, %v841_v14  ;;  %v890_v9 = vadd.f32 %v889_v62, %v888_v44  ;;  %v1279_v44 = vld [vmem:[%s2106_s7] ss:$0 sm:$0xff] }
 0x3a3   : > { %v860_v56 = vsel %vm417_vm0, %v834_v15, 0.0 }
 0x3a4   : > { %v809_v58 = vpop.permute.xlu1 %808  ;;  %v861_v59 = vrot.slane %v860_v56, 4  ;;  %v856_v0 = vrot.slane %v855_v57, 2  ;;  %v851_v22 = vrot.slane %v850_v6, 1  ;;  %v844_v23 = vrot.slane %v843_v7, 1 }
 0x3a5   : > { %v835_v16 = vmul.f32 %v809_v58, %v1813_v18  ;;  %v891_v24 = vrot.slane %v890_v9, 2 }
 0x3a6   : > { %v862_v63 = vadd.f32 %v861_v59, %v860_v56  ;;  %v857_v12 = vadd.f32 %v856_v0, %v855_v57  ;;  %v852_v32 = vadd.f32 %v851_v22, %v850_v6  ;;  %v845_v33 = vadd.f32 %v844_v23, %v843_v7 }
 0x3a7   : > { %v867_v21 = vsel %vm417_vm0, %v835_v16, 0.0  ;;  %v892_v35 = vadd.f32 %v891_v24, %v890_v9 }
 0x3a8   : > { %v868_v2 = vrot.slane %v867_v21, 4  ;;  %v816_v17 = vpop.permute.xlu1 %815  ;;  %v863_v3 = vrot.slane %v862_v63, 2  ;;  %v858_v25 = vrot.slane %v857_v12, 1  ;;  %v1043_v47 = vsel %vm747_vm1, %v852_v32, %v845_v33 }
 0x3a9   : > { %v836_v4 = vmul.f32 %v816_v17, %v1818_v19  ;;  %v893_v48 = vrot.slane %v892_v35, 1 }
 0x3aa   : > { %v869_v5 = vadd.f32 %v868_v2, %v867_v21  ;;  %v864_v13 = vadd.f32 %v863_v3, %v862_v63  ;;  %v859_v38 = vadd.f32 %v858_v25, %v857_v12 }
 0x3ab   : > { %v874_v10 = vsel %vm417_vm0, %v836_v4, 0.0  ;;  %v894_v52 = vadd.f32 %v893_v48, %v892_v35 }
 0x3ac   : > { %v870_v18 = vrot.slane %v869_v5, 2  ;;  %v875_v8 = vrot.slane %v874_v10, 4  ;;  %v823_v11 = vpop.permute.xlu1 %822  ;;  %v865_v28 = vrot.slane %v864_v13, 1  ;;  %v1044_v36 = vsel %vm749_vm2, %v859_v38, %v1043_v47 }
 0x3ad   : > { %v837_v34 = vmul.f32 %v823_v11, %v1823_v20 }
 0x3ae   : > { %v871_v37 = vadd.f32 %v870_v18, %v869_v5  ;;  %v876_v39 = vadd.f32 %v875_v8, %v874_v10  ;;  %v866_v41 = vadd.f32 %v865_v28, %v864_v13 }
 0x3af   : > { %v881_v19 = vsel %vm417_vm0, %v837_v34, 0.0 }
 0x3b0   : > { %v877_v26 = vrot.slane %v876_v39, 2  ;;  %v882_v27 = vrot.slane %v881_v19, 4  ;;  %v872_v29 = vrot.slane %v871_v37, 1  ;;  %v1045_v51 = vsel %vm751_vm3, %v866_v41, %v1044_v36 }
 0x3b2   : > { %v878_v30 = vadd.f32 %v877_v26, %v876_v39  ;;  %v883_v31 = vadd.f32 %v882_v27, %v881_v19  ;;  %v873_v45 = vadd.f32 %v872_v29, %v871_v37 }
 0x3b4   : > { %v879_v40 = vrot.slane %v878_v30, 1  ;;  %v884_v20 = vrot.slane %v883_v31, 2  ;;  %v1046_v1 = vsel %vm753_vm4, %v873_v45, %v1045_v51 }
 0x3b6   : > { %v885_v46 = vadd.f32 %v884_v20, %v883_v31  ;;  %v880_v49 = vadd.f32 %v879_v40, %v878_v30 }
 0x3b8   : > { %v886_v50 = vrot.slane %v885_v46, 1  ;;  %v1047_v53 = vsel %vm755_vm5, %v880_v49, %v1046_v1 }
 0x3ba   : > { %v887_v42 = vadd.f32 %v886_v50, %v885_v46 }
 0x3bc   : > { %v1048_v54 = vsel %vm757_vm6, %v887_v42, %v1047_v53 }
 0x3bd   : > { %v1049_v15 = vsel %vm759_vm7, %v894_v52, %v1048_v54 }
 0x3be   : > { %1351 = vmatmul.mubr.msk.f32.vlgmr.msra.gmra.mrb[16].mxu0 %vm417_vm0, %v1049_v15 }
 0x402   : > { %v1031_v55 = vpop.f32.mrb[0].mxu1 }
 0x403   : > { %v1341_v14 = vpop.f32.mrb[1].mxu1 }
 0x491   : > { %v1118_v56 = vpop.f32.mrb[16].mxu0 }
 0x492   : > { %v1119_v57 = vadd.f32 %v1118_v56, %v1031_v55  ;;  %v1352_v58 = vpop.f32.mrb[17].mxu0 }
 0x494   : > { %v1129_v59 = vadd.f32 %v1279_v44, %v1119_v57 }
 0x496   : > { %v1130_v16 = vsel %vm763_vm9, %v1129_v59, -inf }
 0x497   : > { %1131 = vmax.xlane.f32.xlu1 %v1130_v16 }
 0x524   : > { %v1132_v60 = vpop.xlane.xlu1 %1131 }
 0x525   : > { %v1133_v61 = vsub.f32 %v1129_v59, %v1132_v60 }
 0x527   : > { %v1134_v62 = vmul.f32 1.442695, %v1133_v61 }
 0x529   : > { %1483 = vpow2.f32 %v1134_v62 }
 0x533   : > { %v1484_v63 = vpop.eup %1483 }
 0x534   : > { %v1136_v21 = vsel %vm763_vm9, %v1484_v63, 0.0 }
 0x535   : > { %1137 = vadd.xlane.f32.xlu0 %v1136_v21 }
 0x54b   : > { %1142 = vrot.lane.b32.xlu0 %v1931_v43, %s1593_s28 }
 0x5c2   : > { %v1138_v0 = vpop.xlane.xlu0 %1137 }
 0x5c3   : > { %1485 = vrcp.f32 %v1138_v0 }
 0x5c6   : > { %v1143_v3 = vpop.permute.xlu0 %1142 }
 0x5cd   : > { %v1486_v2 = vpop.eup %1485 }
 0x5ce   : > { %v1140_v17 = vmul.f32 %v1486_v2, %v1484_v63 }
 0x5d0   : > { %v1145_v43 = vsel %vm763_vm9, %v1140_v17, %v1143_v3 }
 0x5d1   : > { %1147 = vst.msk [vmem:[%s381_s30] sm:$0xff] %vm1146_vm11, %v1145_v43 }
 0x5d2   : > { %1530 = shalt.err (!%p1527_p5)
}
 0x5d3   : > { %s1531_s27 = scalar_lea.hbm %s2054_s10, 128  ;;  %s1535_s21 = scalar_lea.hbm %s2108_s9, 256 }
 0x5d4   : > { %p1532_p7 = scmp.ne.s32.totalorder %s2054_s10, %s1531_s27  ;;  %p1536_p3 = scmp.lt.u32.totalorder %s2054_s10, %s2108_s9 }
 0x5d5   : > { %p1537_p11 = scmp.lt.u32.totalorder %s1535_s21, %s1531_s27  ;;  %p1539_p12 = scmp.lt.u32.totalorder %s1531_s27, %s2054_s10 }
 0x5d6   : > { %p1533_p9 = pnand %p1532_p7, %p2119_p13 }
 0x5d7   : > { %p1538_p6 = por %p1537_p11, %p1536_p3 }
 0x5d8   : > { %p1534_p1 = pneg %p1533_p9 }
 0x5d9   : > { %p1540_p8 = por %p1539_p12, %p1538_p6 }
 0x5db   : > { %p1541_p10 = pnand %p1540_p8, %p1534_p1 }
 0x5dd   : > { %1544 = shalt.err (!%p1541_p10)
}
 0x5de   : > { %1393 = dma.vmem_to_hbm [thread:$0]  (%p2119_p13), %s2056_s29, 128, %s2054_s10, %s1149_s8  }
 0x5df PF: > { %s1174_s26 = sand.u32 1, %s1571_s11   ;;  %p2120_p0 = scmp.ne.s32.totalorder %s2115_s23, 0 }
 0x5e0   : > { %p2121_p2 = scmp.ge.s32.totalorder %s1583_s14, 2  ;;  %s1175_s24 = scalar_lea.sflag [#allocation5], %s1174_s26 }
 0x5e2   : > { %p1400_p4 = pnand %p2121_p2, %p2120_p0 }
 0x5e4   : > { %1566 = dma.done.wait (!%p1400_p4), %s1175_s24, 128  }
 0x5e5   : > { %1568 = vsyncadd (!%p1400_p4), %s1175_s24, 4294967168  ;;  %p24_p5 = scmp.ge.s32.totalorder %s1673_s16, 4   ;;  %s2122_s11 = smov %s1575_s12 }
 0x5e6   : > { %s2123_s12 = smov %s1579_s13  ;;  %s2124_s13 = smov %s1685_s19 }
 0x5e7   : > { %s2125_s14 = smov %s1673_s16  ;;  %26 = sbr.rel (!%p24_p5) target bundleno = 8 (0x8), region = 107 }
 0x5ee   :  { %1180 = vsyncpa [#allocation4], 1 }
 0x5ef   :  { %1182 = vsyncpa [#allocation4 + $0x1], 1 }
 0x5f0   :  { %1183 = vsyncpa [#allocation5], 1 }
 0x5f1   :  { %1185 = vsyncpa [#allocation5 + $0x1], 1 }

</bundles_post_ra>
